<compile_context>
chip_gen: v5e
topology: v5e:2x2
jax: 0.10.0
libtpu: 0.0.40
codegen_flags: <defaults>
</compile_context>

<pallas_src>
import functools

import jax
import jax.numpy as jnp
import numpy as np
from jax.experimental import pallas as pl
from jax.experimental.pallas import tpu as pltpu


# ---------------------------------------------------------------------------
# in-kernel helpers
# ---------------------------------------------------------------------------

def _channel_mlp(v, w1t, b1, w2, b2):
    """1x1-conv MLP over channels applied to a pooled (C, 1) f32 vector.

    w1t: (C, Cr) (first conv weight pre-transposed), b1: (1, Cr),
    w2: (C, Cr), b2: (C, 1).  Alternating reduce axes avoid any transpose of
    the pooled vector: lane-broadcast + sublane reduce, then sublane-broadcast
    + lane reduce.
    """
    h = jnp.sum(v * w1t, axis=0, keepdims=True) + b1      # (1, Cr)
    h = jnp.maximum(h, 0.0)                               # ReLU
    return jnp.sum(w2 * h, axis=1, keepdims=True) + b2    # (C, 1)


def _gate_from_pooled(avg, mx, w_ref, br_ref, cr):
    """sigmoid(MLP_a(avg) + MLP_m(max)) from the packed parameter slabs."""
    w = w_ref[...]                                        # (C, 4*Cr + 2) f32
    br = br_ref[...]                                      # (2, Cr) f32
    wa1t = w[:, 0 * cr:1 * cr]
    wa2 = w[:, 1 * cr:2 * cr]
    wm1t = w[:, 2 * cr:3 * cr]
    wm2 = w[:, 3 * cr:4 * cr]
    ba2 = w[:, 4 * cr:4 * cr + 1]
    bm2 = w[:, 4 * cr + 1:4 * cr + 2]
    ba1 = br[0:1, :]
    bm1 = br[1:2, :]
    a = _channel_mlp(avg, wa1t, ba1, wa2, ba2)
    m = _channel_mlp(mx, wm1t, bm1, wm2, bm2)
    return jax.nn.sigmoid(a + m)                          # (C, 1) f32


def _pool_sum_max(x, valid):
    """Lane-axis sum (f32) and max (f32) over x[:, :valid] (valid is static).

    Only the final partial 128-lane column is masked, so the extra VPU cost is
    O(C*128) regardless of tile width, and any undefined data beyond `valid`
    (physical pad lanes or out-of-bounds block columns) never reaches a
    reduction unmasked.
    """
    width = x.shape[-1]
    floor = (valid // 128) * 128
    part = valid - floor
    pieces = []
    if floor > 0:
        head = x[:, :floor]                               # vreg-aligned slice
        pieces.append((
            jnp.sum(head, axis=-1, keepdims=True, dtype=jnp.float32),
            jnp.max(head, axis=-1, keepdims=True).astype(jnp.float32)))
    if part > 0:
        tail = x[:, floor:min(floor + 128, width)]        # <= one vreg column
        lane = jax.lax.broadcasted_iota(jnp.int32, tail.shape, 1)
        ok = lane < part
        pieces.append((
            jnp.sum(jnp.where(ok, tail, 0.0), axis=-1, keepdims=True,
                    dtype=jnp.float32),
            jnp.max(jnp.where(ok, tail, -jnp.inf), axis=-1,
                    keepdims=True).astype(jnp.float32)))
    s, m = pieces[0]
    for ps, pm in pieces[1:]:
        s = s + ps
        m = jnp.maximum(m, pm)
    return s, m


# ---------------------------------------------------------------------------
# kernels
# ---------------------------------------------------------------------------

def _cab_single_kernel(x_ref, w_ref, br_ref, o_ref, *, cr, hw, inv_hw):
    """Whole (C, HW) slab resident: read x once, pool, gate, write once."""
    x = x_ref[0]                                          # (C, HW), input dtype
    s, mx = _pool_sum_max(x, hw)
    g = _gate_from_pooled(s * inv_hw, mx, w_ref, br_ref, cr)
    o_ref[0] = g.astype(x.dtype) * x                      # multiply in input dtype


def _cab_fused_kernel(x_ref, w_ref, br_ref, o_ref,
                      sum_acc, max_acc, gate_acc,
                      *, cr, hw, inv_hw, hw_tile, num_tiles):
    """Fused streaming kernel, grid = (B, 2, nT).

    Phase 0: accumulate sum/max over (C, T) tiles in f32 scratch; on the last
    tile compute the sigmoid gate into VMEM scratch.  Phase 1: re-stream the
    tiles and apply the gate (the gate never touches HBM).
    """
    phase = pl.program_id(1)
    t = pl.program_id(2)
    x = x_ref[0]                                          # (C, T), input dtype
    last = num_tiles - 1
    rem = hw - last * hw_tile                             # static, 0 < rem <= T

    @pl.when(phase == 0)
    def _pool():
        @pl.when(t == 0)
        def _():
            sum_acc[...] = jnp.zeros_like(sum_acc)
            max_acc[...] = jnp.full_like(max_acc, -jnp.inf)

        def _accum(valid):
            s, m = _pool_sum_max(x, valid)
            sum_acc[...] += s
            max_acc[...] = jnp.maximum(max_acc[...], m)

        if rem == hw_tile:                                # HW divides evenly
            _accum(hw_tile)
        else:                                             # mask last tile only
            @pl.when(t != last)
            def _():
                _accum(hw_tile)

            @pl.when(t == last)
            def _():
                _accum(rem)

        @pl.when(t == last)
        def _():
            gate_acc[...] = _gate_from_pooled(
                sum_acc[...] * inv_hw, max_acc[...], w_ref, br_ref, cr)

    @pl.when(phase == 1)
    def _apply():
        # OOB lanes of a ragged last tile compute garbage, but the output
        # copy-out DMA is clamped to the array bounds, so it never lands.
        o_ref[0] = gate_acc[...].astype(o_ref.dtype) * x


# ---------------------------------------------------------------------------
# host-side packing / sizing
# ---------------------------------------------------------------------------

def _pack_params(params):
    """PyTorch-layout 1x1-conv params -> two packed f32 slabs.

    W  = [wa1^T | wa2 | wm1^T | wm2 | ba2 | bm2]  shape (C, 4*Cr + 2)
    Br = [ba1; bm1]                               shape (2, Cr)
    """
    wa1, ba1, wa2, ba2, wm1, bm1, wm2, bm2 = params
    cr, c = wa1.shape
    f32 = jnp.float32
    w = jnp.concatenate(
        [wa1.T.astype(f32), wa2.astype(f32), wm1.T.astype(f32), wm2.astype(f32),
         ba2.reshape(c, 1).astype(f32), bm2.reshape(c, 1).astype(f32)],
        axis=1)
    br = jnp.stack([ba1.astype(f32), bm1.astype(f32)], axis=0)
    return w, br, cr


def _vmem_budget_bytes():
    """Per-generation scoped-VMEM budget: chip capacity minus headroom."""
    cap = 64 << 20                        # conservative fallback (= v7x capacity)
    try:
        cap = int(getattr(pltpu.get_tpu_info(), "vmem_capacity_bytes", cap))
    except Exception:
        pass
    return max(cap - (8 << 20), 16 << 20)


def _round_up(n, m):
    return -(-n // m) * m


def _vmem_2d_bytes(rows, cols, itemsize):
    sub = 8 * max(1, 4 // itemsize)       # sublane packing for the dtype
    return _round_up(rows, sub) * _round_up(cols, 128) * itemsize


def _pick_hw_tile(hw, c, itemsize, requested):
    """Streaming HW tile (multiple of 128 lanes).  No divisor constraint on HW:
    the last tile may be ragged, so an unlucky HW no longer collapses the tile
    to 128 lanes (~29% of HBM roofline)."""
    hw_ceil = _round_up(hw, 128)
    if requested is not None:
        t = max(128, (int(requested) // 128) * 128)
    else:
        # ~4 MiB per streamed buffer: past the ~512-lane efficiency knee on all
        # of v5e/v6e/v7x while staying well inside the per-chip budget with
        # double-buffered in+out tiles.
        t = ((4 << 20) // max(1, c * itemsize) // 128) * 128
        t = max(t, 512)
    return int(min(t, hw_ceil))


# ---------------------------------------------------------------------------
# wrapper
# ---------------------------------------------------------------------------

def cab_forward(x_nchw, params, *, hw_tile=None):
    """Channel Attention Block forward.  x_nchw: (B, C, H, W)."""
    B, C, H, W = x_nchw.shape
    HW = H * W
    itemsize = jnp.dtype(x_nchw.dtype).itemsize
    x = x_nchw.reshape(B, C, HW)                  # unpadded, lane-dense HW axis
    wp, br, cr = _pack_params(params)
    inv_hw = 1.0 / HW

    budget = _vmem_budget_bytes()
    slab = _vmem_2d_bytes(C, HW, itemsize)        # one (C, HW) VMEM buffer
    w_vmem = 2 * (_vmem_2d_bytes(C, 4 * cr + 2, 4) + _vmem_2d_bytes(2, cr, 4))
    overhead = 2 << 20

    single = False
    x_buffering = {}
    if hw_tile is None and 5 * slab + w_vmem + overhead <= budget:
        single = True                             # default double-buffering
    elif hw_tile is None and 3 * slab + w_vmem + overhead <= budget:
        # Few grid steps, huge blocks: single-buffer the big in/out slabs so
        # larger feature maps still take the read-x-once path (saves one full
        # re-read of x vs. the streamed path); matters most on v7x (64 MiB).
        single = True
        x_buffering = dict(pipeline_mode=pl.Buffered(1))

    if single:
        out = pl.pallas_call(
            functools.partial(_cab_single_kernel, cr=cr, hw=HW, inv_hw=inv_hw),
            out_shape=jax.ShapeDtypeStruct((B, C, HW), x.dtype),
            grid_spec=pltpu.PrefetchScalarGridSpec(
                num_scalar_prefetch=0,
                grid=(B,),
                in_specs=[pl.BlockSpec((1, C, HW), lambda b: (b, 0, 0),
                                       **x_buffering),
                          pl.BlockSpec(wp.shape, lambda b: (0, 0)),
                          pl.BlockSpec(br.shape, lambda b: (0, 0))],
                out_specs=pl.BlockSpec((1, C, HW), lambda b: (b, 0, 0),
                                       **x_buffering),
            ),
            compiler_params=pltpu.CompilerParams(
                dimension_semantics=("parallel",),
                vmem_limit_bytes=budget),
        )(x, wp, br)
    else:
        T = _pick_hw_tile(HW, C, itemsize, hw_tile)
        nT = -(-HW // T)
        out = pl.pallas_call(
            functools.partial(_cab_fused_kernel, cr=cr, hw=HW, inv_hw=inv_hw,
                              hw_tile=T, num_tiles=nT),
            out_shape=jax.ShapeDtypeStruct((B, C, HW), x.dtype),
            grid_spec=pltpu.PrefetchScalarGridSpec(
                num_scalar_prefetch=0,
                grid=(B, 2, nT),
                in_specs=[pl.BlockSpec((1, C, T), lambda b, p, t: (b, 0, t)),
                          pl.BlockSpec(wp.shape, lambda b, p, t: (0, 0)),
                          pl.BlockSpec(br.shape, lambda b, p, t: (0, 0))],
                # During the pooling phase the output block index is pinned to
                # tile 0 (p == 0 -> t*p == 0); the apply phase (p == 1) walks
                # the tiles and fully overwrites each output block it visits.
                out_specs=pl.BlockSpec((1, C, T),
                                       lambda b, p, t: (b, 0, t * p)),
                scratch_shapes=[pltpu.VMEM((C, 1), jnp.float32),   # sum acc
                                pltpu.VMEM((C, 1), jnp.float32),   # max acc
                                pltpu.VMEM((C, 1), jnp.float32)],  # gate
            ),
            compiler_params=pltpu.CompilerParams(
                dimension_semantics=("parallel", "arbitrary", "arbitrary"),
                vmem_limit_bytes=budget),
        )(x, wp, br)
        # TODO(synk): for B == 1 on v7x, split the tile axis across the two
        # TensorCores with per-core partial accumulators to avoid idling a core.

    return out.reshape(B, C, H, W)


# ---------------------------------------------------------------------------
# reference + test
# ---------------------------------------------------------------------------

def cab_reference(x_nchw, params):
    """Pure-JAX reference matching PyTorch CAB.forward semantics."""
    wa1, ba1, wa2, ba2, wm1, bm1, wm2, bm2 = params
    avg = jnp.mean(x_nchw, axis=(2, 3))                  # (B, C)
    mx = jnp.max(x_nchw, axis=(2, 3))                    # (B, C)

    def mlp(v, w1, b1, w2, b2):
        h = jnp.maximum(v @ w1.T + b1, 0.0)
        return h @ w2.T + b2

    g = jax.nn.sigmoid(mlp(avg, wa1, ba1, wa2, ba2) + mlp(mx, wm1, bm1, wm2, bm2))
    return g[:, :, None, None] * x_nchw


def make_params(key, C):
    """Synthetic params with nn.Conv2d(1x1) shapes: weight (out, in), bias (out,)."""
    Cr = C // 4
    ks = jax.random.split(key, 8)
    w = lambda k, s: jax.random.normal(k, s, jnp.float32) * 0.1
    return (w(ks[0], (Cr, C)), w(ks[1], (Cr,)),
            w(ks[2], (C, Cr)), w(ks[3], (C,)),
            w(ks[4], (Cr, C)), w(ks[5], (Cr,)),
            w(ks[6], (C, Cr)), w(ks[7], (C,)))


if __name__ == "__main__":
    root = jax.random.PRNGKey(0)
    kx1, kx2, kparam = jax.random.split(root, 3)

    B, C = 2, 4
    params = make_params(kparam, C)

    # 16x16 spatial: flattened HW (256) is a multiple of 128.
    x1 = jax.random.normal(kx1, (B, C, 16, 16), jnp.float32)
    # 15x15 spatial: HW = 225 exercises unpadded ragged lanes + masked tail.
    x2 = jax.random.normal(kx2, (B, C, 15, 15), jnp.float32)

    for x in (x1, x2):
        ref = cab_reference(x, params)

        # default path: single-pass resident-slab kernel
        out = jax.block_until_ready(cab_forward(x, params))
        np.testing.assert_allclose(np.asarray(out), np.asarray(ref),
                                   rtol=1e-5, atol=1e-5)

        # forced HW-tiled fused two-phase path (large feature maps / v7x)
        out_t = jax.block_until_ready(cab_forward(x, params, hw_tile=128))
        np.testing.assert_allclose(np.asarray(out_t), np.asarray(ref),
                                   rtol=1e-5, atol=1e-5)

    print("KERNEL_OK")
</pallas_src>

<mosaic_0001>
module attributes {stable_mosaic.version = 11 : i64} {
  func.func @_cab_single_kernel(%arg0: i32, %arg1: memref<1x4x256xf32, #tpu.memory_space<vmem>>, %arg2: memref<4x6xf32, #tpu.memory_space<vmem>>, %arg3: memref<2x1xf32, #tpu.memory_space<vmem>>, %arg4: memref<1x4x256xf32, #tpu.memory_space<vmem>>) attributes {dimension_semantics = [#tpu.dimension_semantics<parallel>], iteration_bounds = array<i64: 2>, scalar_prefetch = 0 : i64, scratch_operands = 0 : i64, tpu.core_type = #tpu.core_type<tc>, window_params = [{transform_indices = @transform_0, window_bounds = array<i64: 1, 4, 256>}, {pipeline_mode = #tpu.pipeline_mode<synchronous>, transform_indices = @transform_1, window_bounds = array<i64: 4, 6>}, {pipeline_mode = #tpu.pipeline_mode<synchronous>, transform_indices = @transform_2, window_bounds = array<i64: 2, 1>}, {transform_indices = @transform_3, window_bounds = array<i64: 1, 4, 256>}]} {
    %c0 = arith.constant 0 : index
    %c0_0 = arith.constant 0 : index
    %c0_1 = arith.constant 0 : index
    %0 = vector.load %arg1[%c0, %c0_0, %c0_1] : memref<1x4x256xf32, #tpu.memory_space<vmem>>, vector<1x4x256xf32>
    %1 = vector.shape_cast %0 : vector<1x4x256xf32> to vector<4x256xf32>
    %cst = arith.constant dense<0.000000e+00> : vector<4xf32>
    %2 = vector.multi_reduction <add>, %1, %cst [1] : vector<4x256xf32> to vector<4xf32>
    %3 = vector.shape_cast %2 : vector<4xf32> to vector<4x1xf32>
    %cst_2 = arith.constant dense<0xFF800000> : vector<4xf32>
    %4 = vector.multi_reduction <maximumf>, %1, %cst_2 [1] : vector<4x256xf32> to vector<4xf32>
    %5 = vector.shape_cast %4 : vector<4xf32> to vector<4x1xf32>
    %cst_3 = arith.constant 3.906250e-03 : f32
    %6 = vector.broadcast %cst_3 : f32 to vector<4x1xf32>
    %7 = arith.mulf %3, %6 : vector<4x1xf32>
    %c0_4 = arith.constant 0 : index
    %c0_5 = arith.constant 0 : index
    %8 = vector.load %arg2[%c0_4, %c0_5] : memref<4x6xf32, #tpu.memory_space<vmem>>, vector<4x6xf32>
    %c0_6 = arith.constant 0 : index
    %c0_7 = arith.constant 0 : index
    %9 = vector.load %arg3[%c0_6, %c0_7] : memref<2x1xf32, #tpu.memory_space<vmem>>, vector<2x1xf32>
    %10 = vector.extract_strided_slice %8 {offsets = [0, 0], sizes = [4, 1], strides = [1, 1]} : vector<4x6xf32> to vector<4x1xf32>
    %11 = vector.extract_strided_slice %8 {offsets = [0, 1], sizes = [4, 1], strides = [1, 1]} : vector<4x6xf32> to vector<4x1xf32>
    %12 = vector.extract_strided_slice %8 {offsets = [0, 2], sizes = [4, 1], strides = [1, 1]} : vector<4x6xf32> to vector<4x1xf32>
    %13 = vector.extract_strided_slice %8 {offsets = [0, 3], sizes = [4, 1], strides = [1, 1]} : vector<4x6xf32> to vector<4x1xf32>
    %14 = vector.extract_strided_slice %8 {offsets = [0, 4], sizes = [4, 1], strides = [1, 1]} : vector<4x6xf32> to vector<4x1xf32>
    %15 = vector.extract_strided_slice %8 {offsets = [0, 5], sizes = [4, 1], strides = [1, 1]} : vector<4x6xf32> to vector<4x1xf32>
    %16 = vector.extract_strided_slice %9 {offsets = [0, 0], sizes = [1, 1], strides = [1, 1]} : vector<2x1xf32> to vector<1x1xf32>
    %17 = vector.extract_strided_slice %9 {offsets = [1, 0], sizes = [1, 1], strides = [1, 1]} : vector<2x1xf32> to vector<1x1xf32>
    %18 = arith.mulf %7, %10 : vector<4x1xf32>
    %cst_8 = arith.constant dense<0.000000e+00> : vector<1xf32>
    %19 = vector.multi_reduction <add>, %18, %cst_8 [0] : vector<4x1xf32> to vector<1xf32>
    %20 = vector.shape_cast %19 : vector<1xf32> to vector<1x1xf32>
    %21 = arith.addf %20, %16 : vector<1x1xf32>
    %cst_9 = arith.constant 0.000000e+00 : f32
    %22 = vector.broadcast %cst_9 : f32 to vector<1x1xf32>
    %23 = arith.maximumf %21, %22 : vector<1x1xf32>
    %24 = vector.broadcast %23 : vector<1x1xf32> to vector<4x1xf32>
    %25 = arith.mulf %11, %24 : vector<4x1xf32>
    %cst_10 = arith.constant dense<0.000000e+00> : vector<4xf32>
    %26 = vector.multi_reduction <add>, %25, %cst_10 [1] : vector<4x1xf32> to vector<4xf32>
    %27 = vector.shape_cast %26 : vector<4xf32> to vector<4x1xf32>
    %28 = arith.addf %27, %14 : vector<4x1xf32>
    %29 = arith.mulf %5, %12 : vector<4x1xf32>
    %cst_11 = arith.constant dense<0.000000e+00> : vector<1xf32>
    %30 = vector.multi_reduction <add>, %29, %cst_11 [0] : vector<4x1xf32> to vector<1xf32>
    %31 = vector.shape_cast %30 : vector<1xf32> to vector<1x1xf32>
    %32 = arith.addf %31, %17 : vector<1x1xf32>
    %cst_12 = arith.constant 0.000000e+00 : f32
    %33 = vector.broadcast %cst_12 : f32 to vector<1x1xf32>
    %34 = arith.maximumf %32, %33 : vector<1x1xf32>
    %35 = vector.broadcast %34 : vector<1x1xf32> to vector<4x1xf32>
    %36 = arith.mulf %13, %35 : vector<4x1xf32>
    %cst_13 = arith.constant dense<0.000000e+00> : vector<4xf32>
    %37 = vector.multi_reduction <add>, %36, %cst_13 [1] : vector<4x1xf32> to vector<4xf32>
    %38 = vector.shape_cast %37 : vector<4xf32> to vector<4x1xf32>
    %39 = arith.addf %38, %15 : vector<4x1xf32>
    %40 = arith.addf %28, %39 : vector<4x1xf32>
    %41 = arith.negf %40 : vector<4x1xf32>
    %42 = math.exp %41 : vector<4x1xf32>
    %cst_14 = arith.constant 1.000000e+00 : f32
    %43 = vector.broadcast %cst_14 : f32 to vector<4x1xf32>
    %44 = arith.addf %43, %42 : vector<4x1xf32>
    %45 = arith.divf %43, %44 : vector<4x1xf32>
    %46 = vector.broadcast %45 : vector<4x1xf32> to vector<4x256xf32>
    %47 = arith.mulf %46, %1 : vector<4x256xf32>
    %c0_15 = arith.constant 0 : index
    %c0_16 = arith.constant 0 : index
    %c0_17 = arith.constant 0 : index
    %48 = vector.load %arg4[%c0_15, %c0_16, %c0_17] : memref<1x4x256xf32, #tpu.memory_space<vmem>>, vector<1x4x256xf32>
    %49 = vector.shape_cast %48 : vector<1x4x256xf32> to vector<4x256xf32>
    %50 = vector.shape_cast %47 : vector<4x256xf32> to vector<1x4x256xf32>
    tpu.vector_store %arg4[%c0_15, %c0_16, %c0_17], %50 {strides = array<i32>} : memref<1x4x256xf32, #tpu.memory_space<vmem>>, vector<1x4x256xf32>,
    return
  }
  func.func @transform_0(%arg0: i32) -> (i32, i32, i32) {
    %c0_i32 = arith.constant 0 : i32
    %c0_i32_0 = arith.constant 0 : i32
    %c0_i32_1 = arith.constant 0 : i32
    return %arg0, %c0_i32, %c0_i32_0 : i32, i32, i32
  }
  func.func @transform_1(%arg0: i32) -> (i32, i32) {
    %c0_i32 = arith.constant 0 : i32
    %c0_i32_0 = arith.constant 0 : i32
    %c0_i32_1 = arith.constant 0 : i32
    return %c0_i32, %c0_i32_0 : i32, i32
  }
  func.func @transform_2(%arg0: i32) -> (i32, i32) {
    %c0_i32 = arith.constant 0 : i32
    %c0_i32_0 = arith.constant 0 : i32
    %c0_i32_1 = arith.constant 0 : i32
    return %c0_i32, %c0_i32_0 : i32, i32
  }
  func.func @transform_3(%arg0: i32) -> (i32, i32, i32) {
    %c0_i32 = arith.constant 0 : i32
    %c0_i32_0 = arith.constant 0 : i32
    %c0_i32_1 = arith.constant 0 : i32
    return %arg0, %c0_i32, %c0_i32_0 : i32, i32, i32
  }
}

</mosaic_0001>

<bundles_post_ra>
// kernel: tpu_custom_call.1
= control target key start
LH: loop header
LB: loop body
LE: loop exit
PB: predicated region body
PF: predicated region fallthrough
CT: control target
= control target key end

     0   :  { %8 = vsyncpa [#allocation3], 0  ;;  %s815_s0 = inlined_call_operand.hbm [shape: f32[2,4,256], index: 0, kind: input, shape index: {}]   ;;  %s816_s1 = inlined_call_operand.hbm [shape: f32[4,6], index: 1, kind: input, shape index: {}]   ;;  %s817_s2 = inlined_call_operand.vmem [shape: f32[2,1], index: 2, kind: input, shape index: {}]   ;;  %s818_s3 = inlined_call_operand.hbm [shape: f32[2,4,256], index: 3, kind: output, shape index: {}]  }
   0x1   :  { %10 = vsyncpa [#allocation3 + $0x1], 0 }
   0x2   :  { %11 = vsyncpa [#allocation6], 0 }
   0x3   :  { %12 = vsyncpa [#allocation4], 0 }
   0x4   :  { %14 = vsyncpa [#allocation4 + $0x1], 0  ;;  %s663_s12 = smov 0   ;;  %s665_s13 = smov 0  }
   0x5   :  { %s667_s14 = smov 0   ;;  %s669_s15 = smov 0  }
   0x6 LB: > { %s684_s16 = sadd.s32 4294967295, %s635_s15   ;;  %s419_s17 = sadd.s32 4294967294, %s635_s15   ;;  %s635_s15 = sphi %s669_s15, %s828_s15   ;;  %s631_s14 = sphi %s667_s14, %s827_s14   ;;  %s627_s13 = sphi %s665_s13, %s826_s13   ;;  %s623_s12 = sphi %s663_s12, %s825_s12  }
   0x7   : > { %p40_p0 = scmp.ne.s32.totalorder %s627_s13, %s623_s12  ;;  %p41_p1 = scmp.eq.s32.totalorder %s684_s16, 0 }
   0x8   : > { %p106_p2 = scmp.eq.s32.totalorder %s684_s16, 1  ;;  %p112_p3 = scmp.eq.s32.totalorder %s419_s17, 1 }
   0x9   : > { %p693_p4 = por %p41_p1, %p40_p0  ;;  %p420_p5 = scmp.ge.s32.totalorder %s635_s15, 1 }
   0xa   : > { %p698_p6 = por %p112_p3, %p40_p0  ;;  %p119_p7 = scmp.lt.s32.totalorder %s635_s15, 3 }
   0xb   : > { %s131_s22 = sshll.u32 %s816_s1, 4  ;;  %s637_s24 = smov [#allocation5]   ;;  %s132_s22 = int_to_ptr.hbm [resolvable:$true] %s131_s22 }
   0xc   : > { %p706_p8 = pnand %p420_p5, %p119_p7  ;;  %s133_s25 = sshll.u32 %s637_s24, 4  ;;  %s134_s25 = int_to_ptr.vmem [resolvable:$true] %s133_s25 }
   0xd   : > { %s716_s26 = sadd.s32 1, %s635_s15   ;;  %s27_s27 = sadd.s32 1, %s631_s14 }
   0xe   : > { %p446_p10 = pneg %p706_p8  ;;  %s24_s28 = ssub.s32 %s635_s15, %s716_s26 }
   0xf   : > { %p25_p12 = scmp.eq.s32.totalorder %s24_s28, 0  ;;  %p34_p13 = scmp.ne.s32.totalorder %s631_s14, %s627_s13 }
  0x10   : > { %p447_p11 = pnand %p446_p10, %p41_p1  ;;  %p35_p0 = scmp.eq.s32.totalorder %s635_s15, 0 }
  0x11   : > { %s725_s29 = scalar_select %p25_p12, %s631_s14, %s27_s27  }
  0x12   : > { %449 = dma.hbm_to_vmem [thread:$0]  (!%p447_p11), %s132_s22, 64, %s134_s25, [#allocation6]  }
  0x13   : > { %p729_p3 = por %p106_p2, %p34_p13  ;;  %p459_p5 = scmp.lt.s32.totalorder %s635_s15, 2 }
  0x14   : > { %s147_s4 = sand.u32 1, %s631_s14   ;;  %s436_s5 = sshll.u32 %s635_s15, 3 }
  0x15   : > { %p36_p7 = por %p35_p0, %p34_p13  ;;  %s423_s6 = sshll.u32 %s147_s4, 3 }
  0x16   : > { %s156_s9 = scalar_lea.hbm %s815_s0, %s436_s5  ;;  %s151_s11 = scalar_lea.vmem [#allocation2], %s423_s6 }
  0x17   : > { %s158_s10 = sshll.u32 %s156_s9, 4  ;;  %s160_s17 = sshll.u32 %s151_s11, 4  ;;  %s159_s10 = int_to_ptr.hbm [resolvable:$true] %s158_s10  ;;  %s161_s17 = int_to_ptr.vmem [resolvable:$true] %s160_s17 }
  0x18   : > { %p739_p10 = pnand %p459_p5, %p36_p7  ;;  %s148_s21 = scalar_lea.sflag [#allocation3], %s147_s4 }
  0x19   : > { %s535_s22 = sshra.s32 %s159_s10, 4  ;;  %s542_s28 = scalar_lea.hbm %s815_s0, 16  ;;  %s536_s22 = int_to_ptr.hbm [resolvable:$true] %s535_s22 }
  0x1a   : > { %s537_s24 = scalar_lea.hbm %s536_s22, 8  ;;  %p539_p11 = pneg %p739_p10 }
  0x1b   : > { %p538_p2 = scmp.ne.s32.totalorder %s536_s22, %s537_s24  ;;  %p543_p0 = scmp.lt.s32.totalorder %s536_s22, %s815_s0 }
  0x1c   : > { %p544_p5 = scmp.lt.s32.totalorder %s542_s28, %s537_s24 }
  0x1d   : > { %p540_p12 = pnand %p539_p11, %p538_p2 }
  0x1e   : > { %p545_p7 = por %p544_p5, %p543_p0 }
  0x1f   : > { %p541_p13 = pneg %p540_p12 }
  0x21   : > { %p546_p9 = pnand %p545_p7, %p541_p13 }
  0x23   : > { %549 = shalt.err (!%p546_p9)
}
  0x24   : > { %453 = dma.hbm_to_vmem [thread:$0]  (!%p739_p10), %s159_s10, 128, %s161_s17, %s148_s21  }
  0x25   : > { %169 = sbr.rel (%p706_p8) target bundleno = 569 (0x239), region = 32  ;;  %s756_s4 = sand.u32 (!%p706_p8), 1, %s627_s13  }
  0x26   : > { %s427_s7 = sshll.u32 (!%p706_p8), %s756_s4, 3  ;;  %s172_s8 = scalar_lea.sflag (!%p706_p8), [#allocation3], %s756_s4 }
  0x27   : > { %s175_s9 = scalar_lea.vmem (!%p706_p8), [#allocation2], %s427_s7 }
  0x2a   : > { %610 = dma.done.wait (%p693_p4), %s172_s8, 128  }
  0x2b   : > { %612 = vsyncadd (%p693_p4), %s172_s8, 4294967168 }
  0x2c   : > { %614 = dma.done.wait (%p41_p1), [#allocation6], 64  }
  0x2d   : > { %616 = vsyncadd (%p41_p1), [#allocation6], 4294967232  ;;  %v204_v0 = vld [vmem:[%s175_s9] sm:$0xff]  ;;  %vm211_vm0 = vcmask 1043456   ;;  %v229_v11 = vld [vmem:[%s817_s2] sm:$0x3] }
  0x2e   : > { %206 = vst [vmem:[#allocation1] ss:$2 sm:$0xff] %v204_v0  ;;  %v228_v12 = vld [vmem:[#allocation5] sm:$0xf]  ;;  %s638_s10 = smov 126   ;;  %v263_v13 = vrot.slane %v229_v11, 1 }
  0x2f   : > { %276 = vrot.lane.b32.xlu2 %v228_v12, %s638_s10  ;;  %s639_s11 = smov 2   ;;  %vm231_vm1 = vcmask 3072   ;;  %vm254_vm2 = vcmask 19472   ;;  %s640_s17 = smov 1   ;;  %v642_v45 = vmov 1  }
  0x30   : > { %s641_s20 = smov 125   ;;  %500 = vset.pattern.permute.xlu0 %v642_v45  ;;  %s437_s21 = sshll.u32 %s684_s16, 3 }
  0x31   : > { %s334_s25 = scalar_lea.hbm %s818_s3, %s437_s21  ;;  %s203_s27 = scalar_lea.vmem [#allocation7], %s427_s7 }
  0x32   : > { %s336_s28 = sshll.u32 %s203_s27, 4  ;;  %s338_s5 = sshll.u32 %s334_s25, 4  ;;  %s337_s28 = int_to_ptr.vmem [resolvable:$true] %s336_s28  ;;  %s339_s5 = int_to_ptr.hbm [resolvable:$true] %s338_s5 }
  0x33   : > { %s323_s16 = scalar_lea.sflag [#allocation4], %s756_s4  ;;  %s579_s6 = sshra.s32 %s339_s5, 4  ;;  %s580_s6 = int_to_ptr.hbm [resolvable:$true] %s579_s6 }
  0x34   : > { %s581_s8 = scalar_lea.hbm %s580_s6, 8  ;;  %s585_s7 = scalar_lea.hbm %s818_s3, 16 }
  0x35   : > { %v207_v1 = vld.sshfl [vmem:[#allocation1] sm:$0xff pattern:$0x75316420]  ;;  %v208_v2 = vld.sshfl [vmem:[#allocation1 + $0x8] sm:$0xff pattern:$0x75316420]  ;;  %p582_p1 = scmp.ne.s32.totalorder %s580_s6, %s581_s8  ;;  %p586_p9 = scmp.lt.s32.totalorder %s580_s6, %s818_s3 }
  0x36   : > { %217 = vst [vmem:[#allocation1] ss:$2 sm:$0xff] %v204_v0  ;;  %v212_v3 = vsel %vm211_vm0, %v207_v1, 0.0  ;;  %v213_v4 = vsel %vm211_vm0, %v208_v2, 0.0  ;;  %p587_p10 = scmp.lt.s32.totalorder %s585_s7, %s581_s8 }
  0x37   : > { %v214_v5 = vadd.f32 %v213_v4, %v212_v3  ;;  %p583_p4 = pnand %p582_p1, %p729_p3 }
  0x38   : > { %p588_p2 = por %p587_p10, %p586_p9 }
  0x39   : > { %215 = vadd.xlane.f32.xlu1 %v214_v5  ;;  %p584_p8 = pneg %p583_p4 }
  0x3b   : > { %p589_p11 = pnand %p588_p2, %p584_p8 }
  0x3d   : > { %v218_v6 = vld.sshfl [vmem:[#allocation1] sm:$0xff pattern:$0x75316420]  ;;  %v219_v7 = vld.sshfl [vmem:[#allocation1 + $0x8] sm:$0xff pattern:$0x75316420] }
  0x3e   : > { %v222_v8 = vsel %vm211_vm0, %v218_v6, -inf  ;;  %v223_v9 = vsel %vm211_vm0, %v219_v7, -inf  ;;  %309 = vst [vmem:[#allocation1] ss:$2 sm:$0xff] %v204_v0 }
  0x3f   : > { %v224_v10 = vmax.f32 %v222_v8, %v223_v9 }
  0x41   : > { %225 = vmax.xlane.f32.xlu0 %v224_v10 }
  0x45   : > { %v311_v0 = vld.sshfl [vmem:[#allocation1 + $0x8] sm:$0xff pattern:$0x75316420]  ;;  %v310_v1 = vld.sshfl [vmem:[#allocation1] sm:$0xff pattern:$0x75316420] }
  0x55   : > { %264 = vrot.lane.b32.xlu0 %v263_v13, %s639_s11 }
  0x89   : > { %v277_v41 = vpop.permute.xlu2 %276 }
  0xac   : > { %v216_v14 = vpop.xlane.xlu1 %215 }
  0xad   : > { %v227_v15 = vmul.f32 0.00390625, %v216_v14 }
  0xaf   : > { %v230_v16 = vmul.f32 %v228_v12, %v227_v15 }
  0xb1   : > { %v232_v17 = vsel %vm231_vm1, %v230_v16, 0.0 }
  0xb2   : > { %v233_v19 = vrot.slane %v232_v17, 4 }
  0xb4   : > { %v226_v18 = vpop.xlane.xlu0 %225  ;;  %v234_v21 = vadd.f32 %v233_v19, %v232_v17 }
  0xb5   : > { %v253_v20 = vmul.f32 %v228_v12, %v226_v18 }
  0xb6   : > { %v235_v24 = vrot.slane %v234_v21, 2 }
  0xb7   : > { %v255_v22 = vsel %vm254_vm2, %v253_v20, 0.0 }
  0xb8   : > { %v256_v23 = vrot.slane %v255_v22, 4  ;;  %v236_v26 = vadd.f32 %v235_v24, %v234_v21 }
  0xba   : > { %v257_v25 = vadd.f32 %v256_v23, %v255_v22  ;;  %v237_v28 = vrot.slane %v236_v26, 1 }
  0xbc   : > { %v258_v27 = vrot.slane %v257_v25, 2  ;;  %v238_v30 = vadd.f32 %v237_v28, %v236_v26 }
  0xbe   : > { %v259_v29 = vadd.f32 %v258_v27, %v257_v25  ;;  %v239_v31 = vadd.f32 %v238_v30, %v229_v11 }
  0xc0   : > { %v260_v32 = vrot.slane %v259_v29, 1  ;;  %v240_v33 = vmax.f32 %v239_v31, 0.0 }
  0xc2   : > { %v241_v34 = vperm.slane %v240_v33, 0  ;;  %v261_v35 = vadd.f32 %v260_v32, %v259_v29 }
  0xc4   : > { %243 = vrot.lane.b32.xlu2 %v241_v34, %s640_s17 }
  0xc7   : > { %v265_v36 = vpop.permute.xlu0 %264 }
  0xc8   : > { %v267_v37 = vadd.f32 %v265_v36, %v261_v35 }
  0xca   : > { %v268_v38 = vmax.f32 %v267_v37, 0.0 }
  0xcc   : > { %v269_v39 = vperm.slane %v268_v38, 0  ;;  %249 = vrot.lane.b32.xlu2 %v228_v12, %s641_s20 }
  0xce   : > { %271 = vrot.lane.b32.xlu1 %v269_v39, %s640_s17 }
 0x11e   : > { %v244_v44 = vpop.permute.xlu2 %243 }
 0x11f   : > { %v246_v47 = vmul.f32 %v244_v44, %v228_v12 }
 0x126   : > { %v250_v46 = vpop.permute.xlu2 %249 }
 0x127   : > { %v252_v48 = vadd.f32 %v250_v46, %v246_v47 }
 0x140   : > { %v272_v40 = vpop.permute.xlu1 %271 }
 0x141   : > { %v274_v42 = vmul.f32 %v272_v40, %v228_v12 }
 0x143   : > { %v279_v43 = vadd.f32 %v277_v41, %v274_v42 }
 0x145   : > { %281 = vrot.lane.b32.xlu2 %v279_v43, %s638_s10 }
 0x19f   : > { %v282_v49 = vpop.permute.xlu2 %281 }
 0x1a0   : > { %v284_v50 = vadd.f32 %v282_v49, %v252_v48 }
 0x1a2   : > { %v430_v51 = vmul.f32 -1.442695, %v284_v50 }
 0x1a4   : > { %501 = vpow2.f32 %v430_v51 }
 0x1aa   : > { %v502_v52 = vpop.eup %501 }
 0x1ab   : > { %v288_v53 = vadd.f32 1.0, %v502_v52 }
 0x1ad   : > { %503 = vrcp.f32 %v288_v53  ;;  %v300_v57 = vand.u32 2147483648, %v288_v53  ;;  %v298_v59 = vand.u32 2147483647, %v288_v53  ;;  %vm294_vm4 = vweird.f32 %v288_v53 }
 0x1af   : > { %v301_v61 = vor.u32 1.1754944e-38, %v300_v57  ;;  %vm299_vm6 = vcmp.eq.f32.partialorder %v298_v59, 8.507059e+37 }
 0x1b3   : > { %v504_v54 = vpop.eup %503 }
 0x1b4   : > { %v290_v55 = vmul.f32 %v504_v54, %v288_v53  ;;  %vm295_vm3 = vweird.f32 %v504_v54 }
 0x1b5   : > { %vm296_vm5 = vmor %vm294_vm4, %vm295_vm3 }
 0x1b6   : > { %v291_v56 = vsub.f32 1.0, %v290_v55 }
 0x1b8   : > { %v292_v58 = vmul.f32 %v504_v54, %v291_v56 }
 0x1ba   : > { %v293_v60 = vadd.f32 %v504_v54, %v292_v58 }
 0x1bc   : > { %v297_v62 = vsel %vm296_vm5, %v504_v54, %v293_v60 }
 0x1bd   : > { %v302_v63 = vsel %vm299_vm6, %v301_v61, %v297_v62 }
 0x1be   : > { %306 = vperm.xlu0 %500, %v302_v63  }
 0x230   : > { %v307_v2 = vpop.permute.xlu0 %306 }
 0x231   : > { %v315_v3 = vmul.f32 %v311_v0, %v307_v2  ;;  %v314_v4 = vmul.f32 %v310_v1, %v307_v2 }
 0x233   : > { %v318_v5 = vrot.slane %v315_v3, 4 }
 0x235   : > { %v319_v6 = vsel %vm211_vm0, %v314_v4, %v318_v5 }
 0x236   : > { %321 = vst [vmem:[%s203_s27] sm:$0xff] %v319_v6 }
 0x237   : > { %592 = shalt.err (!%p589_p11)
}
 0x238   : > { %444 = dma.vmem_to_hbm [thread:$0]  (%p729_p3), %s337_s28, 128, %s339_s5, %s323_s16  }
 0x239 PF: > { %s350_s4 = sand.u32 1, %s623_s12   ;;  %p824_p12 = scmp.ge.s32.totalorder %s635_s15, 2 }
 0x23a   : > { %s351_s11 = scalar_lea.sflag [#allocation4], %s350_s4 }
 0x23b   : > { %p455_p13 = pnand %p824_p12, %p698_p6 }
 0x23d   : > { %p456_p0 = pneg %p455_p13 }
 0x23f   : > { %618 = dma.done.wait (%p456_p0), %s351_s11, 128  }
 0x240   : > { %620 = vsyncadd (%p456_p0), %s351_s11, 4294967168  ;;  %p17_p5 = scmp.ge.s32.totalorder %s716_s26, 4   ;;  %s825_s12 = smov %s627_s13 }
 0x241   : > { %s826_s13 = smov %s631_s14  ;;  %s827_s14 = smov %s725_s29 }
 0x242   : > { %s828_s15 = smov %s716_s26  ;;  %19 = sbr.rel (!%p17_p5) target bundleno = 6 (0x6), region = 81 }
 0x247   :  { %357 = vsyncpa [#allocation3], 1 }
 0x248   :  { %359 = vsyncpa [#allocation3 + $0x1], 1 }
 0x249   :  { %360 = vsyncpa [#allocation6], 1 }
 0x24a   :  { %361 = vsyncpa [#allocation4], 1 }
 0x24b   :  { %363 = vsyncpa [#allocation4 + $0x1], 1 }

</bundles_post_ra>
